<compile_context>
chip_gen: v7x
topology: tpu7x:2x2x1
jax: 0.10.0
libtpu: 0.0.40
codegen_flags: <defaults>
</compile_context>

<pallas_src>
import functools

import jax
import jax.numpy as jnp
from jax.experimental import pallas as pl
from jax.experimental.pallas import tpu as pltpu

LANE = 128                      # vreg lane width
ROW_CAP = 4096                  # max tile rows: (4096,128) f32 = 2 MiB / input / step
PAD_LOGIT = -1e4                # exp(-1e4) == 0 in f32 -> per-element loss == 0 exactly
L2_KERNEL_MIN_ELEMS = 32 * 1024 # params smaller than this take the plain-jnp path
VMEM_LIMIT = 32 * 1024 * 1024   # safe on all gens (v7x physical is 64 MiB)


def _num_tensorcores():
    """2 for dual-TensorCore chips (v4 / v5p / v7x style), 1 for v5e/v6e."""
    try:
        kind = jax.devices()[0].device_kind.lower()
    except Exception:
        return 1
    if "v7" in kind or "v4" in kind:
        return 2
    if "v5p" in kind:
        return 2
    if "v5" in kind and "lite" not in kind and "5e" not in kind:
        return 2  # plain "TPU v5" (v5p)
    return 1      # v5e / v6e / unknown -> single TensorCore


def _tile_rows(M, slices):
    """Pick (tm, blocks_per_slice, slices) such that every block's start row is
    in bounds (only the LAST block may be partial; it is masked in-kernel)."""
    if M >= ROW_CAP:
        tm = ROW_CAP
    else:
        tm = (M // 8) * 8                      # largest multiple of 8 that is <= M
    if slices > 1 and M < 2 * slices * tm:     # not enough work to split
        slices = 1
    bps = pl.cdiv(M, tm * slices)
    if (slices * bps - 1) * tm >= M:           # would create a fully-OOB block
        slices = 1
        bps = pl.cdiv(M, tm)
    return tm, bps, slices


# ---------------------------------------------------------------------------
# Kernel 1: sum of BCEWithLogits(x, y) over a (rows, 128) slab.
#   per-element: max(x, 0) - x*y + log1p(exp(-|x|))   (numerically stable)
# Grid = (slices, blocks_per_slice); output block (1, 8, 128) is resident over
# the "arbitrary" reduction axis and accumulated with pure VALU adds.
# ---------------------------------------------------------------------------
def _bce_sum_kernel(pred_ref, true_ref, out_ref, *, tm, bps, valid_rows, needs_mask):
    c = pl.program_id(0)
    k = pl.program_id(1)

    @pl.when(k == 0)
    def _():
        out_ref[...] = jnp.zeros_like(out_ref)

    x = pred_ref[...].astype(jnp.float32)   # DMA native dtype, upcast in VMEM
    y = true_ref[...].astype(jnp.float32)

    if needs_mask:
        # mask the ragged tail BEFORE exp/log1p: padded logits give exactly 0 loss
        row0 = (c * bps + k) * tm
        rows = row0 + jax.lax.broadcasted_iota(jnp.int32, (tm, LANE), 0)
        valid = rows < valid_rows
        x = jnp.where(valid, x, PAD_LOGIT)
        y = jnp.where(valid, y, 0.0)

    loss = jnp.maximum(x, 0.0) - x * y + jnp.log1p(jnp.exp(-jnp.abs(x)))
    # reduce the (tm,128) tile to an (8,128) strip: sublane-aligned VALU adds only
    partial = jnp.sum(loss.reshape(tm // 8, 8, LANE), axis=0)
    out_ref[...] += partial.reshape(out_ref.shape)


def _jnp_bce_sum(x, y):
    x = x.astype(jnp.float32)
    y = y.astype(jnp.float32)
    return jnp.sum(jnp.maximum(x, 0.0) - x * y + jnp.log1p(jnp.exp(-jnp.abs(x))))


def bce_with_logits_mean(y_pred, y_true):
    total = int(y_pred.size)
    x_flat = y_pred.reshape(-1)
    y_flat = y_true.reshape(-1)

    M = total // LANE            # full lane-dense rows
    rem = total - M * LANE

    if M < 8:                    # tiny input: not worth a kernel launch
        return _jnp_bce_sum(x_flat, y_flat) / total

    if rem == 0:
        x_bulk = x_flat.reshape(M, LANE)      # zero-copy reshape
        y_bulk = y_flat.reshape(M, LANE)
        tail_sum = jnp.float32(0.0)
    else:
        # rare misaligned case: lane-aligned bulk + tiny (<128 elem) jnp tail
        x_bulk = jax.lax.slice(x_flat, (0,), (M * LANE,)).reshape(M, LANE)
        y_bulk = jax.lax.slice(y_flat, (0,), (M * LANE,)).reshape(M, LANE)
        tail_sum = _jnp_bce_sum(jax.lax.slice(x_flat, (M * LANE,), (total,)),
                                jax.lax.slice(y_flat, (M * LANE,), (total,)))

    slices = _num_tensorcores()
    tm, bps, slices = _tile_rows(M, slices)
    needs_mask = (slices * bps * tm) != M

    kernel = functools.partial(_bce_sum_kernel, tm=tm, bps=bps,
                               valid_rows=M, needs_mask=needs_mask)

    out = pl.pallas_call(
        kernel,
        out_shape=jax.ShapeDtypeStruct((slices, 8, LANE), jnp.float32),
        grid_spec=pltpu.PrefetchScalarGridSpec(
            num_scalar_prefetch=0,
            grid=(slices, bps),
            in_specs=[
                pl.BlockSpec((tm, LANE), lambda c, k: (c * bps + k, 0)),
                pl.BlockSpec((tm, LANE), lambda c, k: (c * bps + k, 0)),
            ],
            out_specs=pl.BlockSpec((1, 8, LANE), lambda c, k: (c, 0, 0)),
        ),
        compiler_params=pltpu.CompilerParams(
            dimension_semantics=("parallel", "arbitrary"),
            vmem_limit_bytes=VMEM_LIMIT,
        ),
    )(x_bulk, y_bulk)

    return (jnp.sum(out) + tail_sum) / total


# ---------------------------------------------------------------------------
# Kernel 2: sum of squares of one (large) parameter tensor, same structure.
# ---------------------------------------------------------------------------
def _sumsq_kernel(x_ref, out_ref, *, tm, bps, valid_rows, needs_mask):
    c = pl.program_id(0)
    k = pl.program_id(1)

    @pl.when(k == 0)
    def _():
        out_ref[...] = jnp.zeros_like(out_ref)

    v = x_ref[...].astype(jnp.float32)      # native dtype streamed, upcast here
    if needs_mask:
        row0 = (c * bps + k) * tm
        rows = row0 + jax.lax.broadcasted_iota(jnp.int32, (tm, LANE), 0)
        v = jnp.where(rows < valid_rows, v, 0.0)

    sq = v * v
    partial = jnp.sum(sq.reshape(tm // 8, 8, LANE), axis=0)
    out_ref[...] += partial.reshape(out_ref.shape)


def _param_sumsq(p):
    """sum(p**2): Pallas streaming for big lane-aligned tensors, jnp otherwise."""
    size = int(p.size)
    flat = p.reshape(-1)
    if size < L2_KERNEL_MIN_ELEMS or size % LANE != 0:
        v = flat.astype(jnp.float32)
        return jnp.sum(v * v)

    M = size // LANE
    slices = _num_tensorcores()
    tm, bps, slices = _tile_rows(M, slices)
    needs_mask = (slices * bps * tm) != M

    kernel = functools.partial(_sumsq_kernel, tm=tm, bps=bps,
                               valid_rows=M, needs_mask=needs_mask)

    out = pl.pallas_call(
        kernel,
        out_shape=jax.ShapeDtypeStruct((slices, 8, LANE), jnp.float32),
        grid_spec=pltpu.PrefetchScalarGridSpec(
            num_scalar_prefetch=0,
            grid=(slices, bps),
            in_specs=[pl.BlockSpec((tm, LANE), lambda c, k: (c * bps + k, 0))],
            out_specs=pl.BlockSpec((1, 8, LANE), lambda c, k: (c, 0, 0)),
        ),
        compiler_params=pltpu.CompilerParams(
            dimension_semantics=("parallel", "arbitrary"),
            vmem_limit_bytes=VMEM_LIMIT,
        ),
    )(flat.reshape(M, LANE))                # zero-copy, native dtype
    return jnp.sum(out)


def params_l2_sum(params):
    """sum_p ||p||_2  (torch.norm(p, 2) summed over parameters)."""
    total = jnp.float32(0.0)
    for p in params:
        if int(p.size) == 0:
            continue
        total = total + jnp.sqrt(_param_sumsq(p))
    return total


# ---------------------------------------------------------------------------
# BCE_L2.forward equivalent
# ---------------------------------------------------------------------------
def bce_l2_loss(y_pred, y_true, params=None, l2_lambda=0.0):
    loss = bce_with_logits_mean(y_pred, y_true)
    if params is not None and l2_lambda > 0:
        loss = loss + l2_lambda * params_l2_sum(params)
    return loss


if __name__ == "__main__":
    key = jax.random.PRNGKey(0)
    k1, k2, k3, k4, k5, k6, k7 = jax.random.split(key, 7)

    def ref_bce_mean(xp, yp):
        xp = xp.astype(jnp.float32).reshape(-1)
        yp = yp.astype(jnp.float32).reshape(-1)
        return jnp.mean(jnp.maximum(xp, 0.0) - xp * yp + jnp.log1p(jnp.exp(-jnp.abs(xp))))

    # Case 1: lane-aligned NCHW-like logits/targets (zero-copy kernel path) + L2 term.
    y_pred = jax.random.normal(k1, (2, 4, 16, 16), dtype=jnp.float32)
    y_true = jax.random.bernoulli(k2, 0.5, (2, 4, 16, 16)).astype(jnp.float32)

    params = [
        0.1 * jax.random.normal(k3, (256, 128), dtype=jnp.float32),  # large -> Pallas path
        0.1 * jax.random.normal(k4, (32, 16), dtype=jnp.float32),    # small -> jnp path
        0.1 * jax.random.normal(k5, (32,), dtype=jnp.float32),       # small -> jnp path
    ]
    l2_lambda = 0.01

    loss = jax.block_until_ready(
        bce_l2_loss(y_pred, y_true, params=params, l2_lambda=l2_lambda))
    ref = ref_bce_mean(y_pred, y_true) + l2_lambda * sum(
        jnp.linalg.norm(p.reshape(-1)) for p in params)
    assert jnp.allclose(loss, ref, rtol=1e-5, atol=1e-5), (loss, ref)

    # Case 2: row count not a multiple of the tile (exercises in-kernel tail masking).
    y_pred2 = jax.random.normal(k6, (5, 3, 16, 16), dtype=jnp.float32)
    y_true2 = jax.random.bernoulli(k7, 0.5, (5, 3, 16, 16)).astype(jnp.float32)
    loss2 = jax.block_until_ready(bce_l2_loss(y_pred2, y_true2))
    assert jnp.allclose(loss2, ref_bce_mean(y_pred2, y_true2), rtol=1e-5, atol=1e-5)

    # Case 3: element count not a multiple of 128 (aligned bulk kernel + jnp tail).
    y_pred3 = jax.random.normal(k6, (10, 103), dtype=jnp.float32)
    y_true3 = jax.random.bernoulli(k7, 0.5, (10, 103)).astype(jnp.float32)
    loss3 = jax.block_until_ready(bce_l2_loss(y_pred3, y_true3))
    assert jnp.allclose(loss3, ref_bce_mean(y_pred3, y_true3), rtol=1e-5, atol=1e-5)

    print("KERNEL_OK")
</pallas_src>

<mosaic_0001>
module attributes {stable_mosaic.version = 11 : i64} {
  func.func @_bce_sum_kernel(%arg0: i32, %arg1: i32, %arg2: memref<16x128xf32, #tpu.memory_space<vmem>>, %arg3: memref<16x128xf32, #tpu.memory_space<vmem>>, %arg4: memref<1x8x128xf32, #tpu.memory_space<vmem>>) attributes {dimension_semantics = [#tpu.dimension_semantics<parallel>, #tpu.dimension_semantics<arbitrary>], iteration_bounds = array<i64: 1, 1>, scalar_prefetch = 0 : i64, scratch_operands = 0 : i64, tpu.core_type = #tpu.core_type<tc>, window_params = [{transform_indices = @transform_0, window_bounds = array<i64: 16, 128>}, {transform_indices = @transform_1, window_bounds = array<i64: 16, 128>}, {transform_indices = @transform_2, window_bounds = array<i64: 1, 8, 128>}]} {
    %c0_i32 = arith.constant 0 : i32
    %0 = arith.cmpi eq, %arg1, %c0_i32 : i32
    %1 = arith.extui %0 : i1 to i32
    %c0_i32_0 = arith.constant 0 : i32
    %2 = arith.cmpi ne, %1, %c0_i32_0 : i32
    scf.if %2 {
      %cst_12 = arith.constant 0.000000e+00 : f32
      %21 = vector.broadcast %cst_12 : f32 to vector<1x8x128xf32>
      %c0_13 = arith.constant 0 : index
      %c0_14 = arith.constant 0 : index
      %c0_15 = arith.constant 0 : index
      %22 = vector.load %arg4[%c0_13, %c0_14, %c0_15] : memref<1x8x128xf32, #tpu.memory_space<vmem>>, vector<1x8x128xf32>
      tpu.vector_store %arg4[%c0_13, %c0_14, %c0_15], %21 {strides = array<i32>} : memref<1x8x128xf32, #tpu.memory_space<vmem>>, vector<1x8x128xf32>,
    } else {
    }
    %c0 = arith.constant 0 : index
    %c0_1 = arith.constant 0 : index
    %3 = vector.load %arg2[%c0, %c0_1] : memref<16x128xf32, #tpu.memory_space<vmem>>, vector<16x128xf32>
    %c0_2 = arith.constant 0 : index
    %c0_3 = arith.constant 0 : index
    %4 = vector.load %arg3[%c0_2, %c0_3] : memref<16x128xf32, #tpu.memory_space<vmem>>, vector<16x128xf32>
    %cst = arith.constant 0.000000e+00 : f32
    %5 = vector.broadcast %cst : f32 to vector<16x128xf32>
    %6 = arith.maximumf %3, %5 : vector<16x128xf32>
    %7 = arith.mulf %3, %4 : vector<16x128xf32>
    %8 = arith.subf %6, %7 : vector<16x128xf32>
    %9 = math.absf %3 : vector<16x128xf32>
    %cst_4 = arith.constant 0.000000e+00 : f32
    %10 = vector.broadcast %cst_4 : f32 to vector<16x128xf32>
    %11 = arith.subf %10, %9 : vector<16x128xf32>
    %12 = math.exp %11 : vector<16x128xf32>
    %13 = math.log1p %12 : vector<16x128xf32>
    %14 = arith.addf %8, %13 : vector<16x128xf32>
    %15 = vector.shape_cast %14 : vector<16x128xf32> to vector<2x8x128xf32>
    %cst_5 = arith.constant dense<0.000000e+00> : vector<8x128xf32>
    %16 = vector.multi_reduction <add>, %15, %cst_5 [0] : vector<2x8x128xf32> to vector<8x128xf32>
    %c0_6 = arith.constant 0 : index
    %c0_7 = arith.constant 0 : index
    %c0_8 = arith.constant 0 : index
    %17 = vector.load %arg4[%c0_6, %c0_7, %c0_8] : memref<1x8x128xf32, #tpu.memory_space<vmem>>, vector<1x8x128xf32>
    %18 = vector.shape_cast %16 : vector<8x128xf32> to vector<1x8x128xf32>
    %19 = arith.addf %17, %18 : vector<1x8x128xf32>
    %c0_9 = arith.constant 0 : index
    %c0_10 = arith.constant 0 : index
    %c0_11 = arith.constant 0 : index
    %20 = vector.load %arg4[%c0_9, %c0_10, %c0_11] : memref<1x8x128xf32, #tpu.memory_space<vmem>>, vector<1x8x128xf32>
    tpu.vector_store %arg4[%c0_9, %c0_10, %c0_11], %19 {strides = array<i32>} : memref<1x8x128xf32, #tpu.memory_space<vmem>>, vector<1x8x128xf32>,
    return
  }
  func.func @transform_0(%arg0: i32, %arg1: i32) -> (i32, i32) {
    %c1_i32 = arith.constant 1 : i32
    %0 = arith.muli %arg0, %c1_i32 : i32
    %1 = arith.addi %0, %arg1 : i32
    %c0_i32 = arith.constant 0 : i32
    %c0_i32_0 = arith.constant 0 : i32
    return %1, %c0_i32 : i32, i32
  }
  func.func @transform_1(%arg0: i32, %arg1: i32) -> (i32, i32) {
    %c1_i32 = arith.constant 1 : i32
    %0 = arith.muli %arg0, %c1_i32 : i32
    %1 = arith.addi %0, %arg1 : i32
    %c0_i32 = arith.constant 0 : i32
    %c0_i32_0 = arith.constant 0 : i32
    return %1, %c0_i32 : i32, i32
  }
  func.func @transform_2(%arg0: i32, %arg1: i32) -> (i32, i32, i32) {
    %c0_i32 = arith.constant 0 : i32
    %c0_i32_0 = arith.constant 0 : i32
    %c0_i32_1 = arith.constant 0 : i32
    return %arg0, %c0_i32, %c0_i32_0 : i32, i32, i32
  }
}

</mosaic_0001>

<bundles_post_ra>
// kernel: tpu_custom_call.1
= control target key start
LH: loop header
LB: loop body
LE: loop exit
PB: predicated region body
PF: predicated region fallthrough
CT: control target
= control target key end

     0   :  { %7 = vsyncpa [#allocation3], 0  ;;  %s257_s0 = inlined_call_operand.hbm [shape: f32[16,128], index: 0, kind: input, shape index: {}]   ;;  %s258_s1 = inlined_call_operand.hbm [shape: f32[16,128], index: 1, kind: input, shape index: {}]   ;;  %s259_s2 = inlined_call_operand.hbm [shape: f32[1,8,128], index: 2, kind: output, shape index: {}]  }
   0x1   :  { %8 = vsyncpa [#allocation6], 0 }
   0x2   :  { %9 = vsyncpa [#allocation4], 0  ;;  %s201_s9 = smov [#allocation2]   ;;  %s129_s13 = scalar_lea.hbm %s257_s0, 256 }
   0x3   :  { %s19_s10 = sshll.u32 %s201_s9, 4  ;;  %p130_p0 = scmp.ne.s32.totalorder %s257_s0, %s129_s13  ;;  %s20_s10 = int_to_ptr.vmem [resolvable:$true] %s19_s10 }
   0x4   :  { %p133_p1 = scmp.lt.u32.totalorder %s129_s13, %s257_s0 }
   0x6   :  { %p135_p2 = pnand %p133_p1, %p130_p0 }
   0x8   :  { %138 = shalt.err (!%p135_p2)
}
   0x9   :  { %s139_s18 = scalar_lea.vmem %s20_s10, 256  ;;  %p144_p4 = scmp.lt.s32.totalorder %s20_s10, %s20_s10 }
   0xa   :  { %p140_p3 = scmp.ne.s32.totalorder %s20_s10, %s139_s18  ;;  %p145_p5 = scmp.lt.s32.totalorder %s139_s18, %s139_s18 }
   0xc   :  { %p146_p6 = por %p145_p5, %p144_p4 }
   0xe   :  { %p147_p7 = pnand %p146_p6, %p140_p3 }
  0x10   :  { %150 = shalt.err (!%p147_p7)
}
  0x11   :  { %s202_s19 = smov 128   ;;  %s203_s20 = smov 8  }
  0x12   :  { %25 = dma.hbm_to_vmem [thread:$0]  %s257_s0, 256, %s20_s10, [#allocation3], %s202_s19, %s202_s19, %s203_s20  }
  0x13   :  { %s204_s23 = smov [#allocation5]   ;;  %s151_s27 = scalar_lea.hbm %s258_s1, 256 }
  0x14   :  { %s35_s24 = sshll.u32 %s204_s23, 4  ;;  %p152_p8 = scmp.ne.s32.totalorder %s258_s1, %s151_s27  ;;  %s36_s24 = int_to_ptr.vmem [resolvable:$true] %s35_s24 }
  0x15   :  { %p155_p9 = scmp.lt.u32.totalorder %s151_s27, %s258_s1 }
  0x17   :  { %p157_p10 = pnand %p155_p9, %p152_p8 }
  0x19   :  { %160 = shalt.err (!%p157_p10)
}
  0x1a   :  { %s161_s4 = scalar_lea.vmem %s36_s24, 256  ;;  %p166_p12 = scmp.lt.s32.totalorder %s36_s24, %s36_s24 }
  0x1b   :  { %p162_p11 = scmp.ne.s32.totalorder %s36_s24, %s161_s4  ;;  %p167_p13 = scmp.lt.s32.totalorder %s161_s4, %s161_s4 }
  0x1d   :  { %p168_p0 = por %p167_p13, %p166_p12 }
  0x1f   :  { %p169_p1 = pnand %p168_p0, %p162_p11 }
  0x21   :  { %172 = shalt.err (!%p169_p1)
}
  0x22   :  { %41 = dma.hbm_to_vmem [thread:$0]  %s258_s1, 256, %s36_s24, [#allocation6], %s202_s19, %s202_s19, %s203_s20  }
  0x23   :  { %195 = dma.done.wait [#allocation3], 256  }
  0x24   :  { %196 = vsyncadd [#allocation3], 4294967040 }
  0x25   :  { %197 = dma.done.wait [#allocation6], 256  }
  0x26   :  { %198 = vsyncadd [#allocation6], 4294967040  ;;  %v57_v0 = vld [vmem:[#allocation2] sm:$0xff]  ;;  %v58_v1 = vld [vmem:[#allocation2 + $0x8] sm:$0xff]  ;;  %s205_s1 = smov [#allocation7]  }
  0x27   :  { %v67_v2 = vand.u32 2147483647, %v57_v0  ;;  %v68_v3 = vand.u32 2147483647, %v58_v1  ;;  %v59_v14 = vld [vmem:[#allocation5] sm:$0xff]  ;;  %v60_v15 = vld [vmem:[#allocation5 + $0x8] sm:$0xff] }
  0x28   :  { %v61_v17 = vmax.f32 %v57_v0, 0.0  ;;  %v63_v18 = vmul.f32 %v59_v14, %v57_v0  ;;  %v62_v21 = vmax.f32 %v58_v1, 0.0  ;;  %v64_v22 = vmul.f32 %v60_v15, %v58_v1  ;;  %s105_s6 = sshll.u32 %s205_s1, 4  ;;  %s106_s6 = int_to_ptr.vmem [resolvable:$true] %s105_s6 }
  0x29   :  { %v69_v4 = vsub.f32 0.0, %v67_v2  ;;  %v70_v5 = vsub.f32 0.0, %v68_v3  ;;  %s173_s7 = scalar_lea.vmem %s106_s6, 128  ;;  %p178_p3 = scmp.lt.s32.totalorder %s106_s6, %s106_s6 }
  0x2a   :  { %v65_v26 = vsub.f32 %v61_v17, %v63_v18  ;;  %v66_v29 = vsub.f32 %v62_v21, %v64_v22  ;;  %p174_p2 = scmp.ne.s32.totalorder %s106_s6, %s173_s7  ;;  %p179_p4 = scmp.lt.s32.totalorder %s173_s7, %s173_s7 }
  0x2b   :  { %v71_v6 = vmul.f32 1.442695, %v69_v4  ;;  %v73_v7 = vmul.f32 1.442695, %v70_v5 }
  0x2c   :  { %p180_p5 = por %p179_p4, %p178_p3 }
  0x2d   :  { %121 = vpow2.f32 %v71_v6 }
  0x2e   :  { %123 = vpow2.f32 %v73_v7  ;;  %p181_p6 = pnand %p180_p5, %p174_p2 }
  0x37   :  { %v122_v8 = vpop.eup %121 }
  0x38   :  { %v124_v9 = vpop.eup %123  ;;  %v75_v10 = vadd.f32 1.0, %v122_v8  ;;  %v78_v12 = vmul.f32 -0.5, %v122_v8  ;;  %v81_v19 = vand.u32 2147483647, %v122_v8 }
  0x39   :  { %v84_v11 = vadd.f32 1.0, %v124_v9  ;;  %v87_v13 = vmul.f32 -0.5, %v124_v9  ;;  %v90_v23 = vand.u32 2147483647, %v124_v9 }
  0x3a   :  { %125 = vlog2.f32 %v75_v10  ;;  %v79_v16 = vadd.f32 1.0, %v78_v12  ;;  %vm82_vm0 = vcmp.lt.f32.partialorder %v81_v19, 0.0004427343 }
  0x3b   :  { %127 = vlog2.f32 %v84_v11  ;;  %v88_v20 = vadd.f32 1.0, %v87_v13  ;;  %vm91_vm1 = vcmp.lt.f32.partialorder %v90_v23, 0.0004427343 }
  0x3c   :  { %v80_v24 = vmul.f32 %v122_v8, %v79_v16 }
  0x3d   :  { %v89_v27 = vmul.f32 %v124_v9, %v88_v20 }
  0x44   :  { %v126_v25 = vpop.eup %125 }
  0x45   :  { %v128_v28 = vpop.eup %127  ;;  %v77_v30 = vmul.f32 0.6931472, %v126_v25 }
  0x46   :  { %v86_v31 = vmul.f32 0.6931472, %v128_v28 }
  0x47   :  { %v83_v32 = vsel %vm82_vm0, %v80_v24, %v77_v30 }
  0x48   :  { %v92_v33 = vsel %vm91_vm1, %v89_v27, %v86_v31  ;;  %v93_v34 = vadd.f32 %v83_v32, %v65_v26 }
  0x49   :  { %v94_v35 = vadd.f32 %v92_v33, %v66_v29 }
  0x4b   :  { %v95_v36 = vadd.f32 %v94_v35, %v93_v34 }
  0x4d   :  { %98 = vst [vmem:[#allocation7] sm:$0xff] %v95_v36 }
  0x4e   :  { %184 = shalt.err (!%p181_p6)
}
  0x4f   :  { %s185_s10 = scalar_lea.hbm %s259_s2, 128 }
  0x50   :  { %p186_p7 = scmp.ne.s32.totalorder %s259_s2, %s185_s10  ;;  %p189_p8 = scmp.lt.u32.totalorder %s185_s10, %s259_s2 }
  0x52   :  { %p191_p9 = pnand %p189_p8, %p186_p7 }
  0x54   :  { %194 = shalt.err (!%p191_p9)
}
  0x55   :  { %108 = dma.vmem_to_hbm [thread:$0]  %s106_s6, 128, %s259_s2, [#allocation4]  }
  0x56   :  { %199 = dma.done.wait [#allocation4], 128  }
  0x57   :  { %200 = vsyncadd [#allocation4], 4294967168 }
  0x58   :  { %112 = vsyncpa [#allocation3], 1 }
  0x59   :  { %113 = vsyncpa [#allocation6], 1 }
  0x5a   :  { %114 = vsyncpa [#allocation4], 1 }

</bundles_post_ra>
